<compile_context>
chip_gen: v7x
topology: tpu7x:2x2x1
jax: 0.10.0
libtpu: 0.0.40
codegen_flags: <defaults>
</compile_context>

<pallas_src>
import functools

import jax
import jax.numpy as jnp
from jax.experimental import pallas as pl
from jax.experimental.pallas import tpu as pltpu


def _lstm_fused_kernel(x_ref, w_ih_ref, b_ref, w_hh_ref, h_out_ref,
                       gx_scr, h_scr, c_scr, *,
                       hidden_size, chunk, seq_len, ragged, unroll):
    """One grid step = (batch shard, time chunk).

    x_ref     : (Tc, Bb, D)  bf16  time-major chunk of the input sequence
    w_ih_ref  : (D, 4H)      bf16  input weights      (whole array, VMEM resident)
    b_ref     : (1, 4H)      f32   b_ih + b_hh        (whole array, VMEM resident)
    w_hh_ref  : (H, 4H)      bf16  recurrent weights  (whole array, VMEM resident)
    h_out_ref : (Bb, H)      f32   last hidden state of this batch shard
    gx_scr    : (Tc, Bb, 4H) f32   per-chunk precomputed input gates
    h_scr/c_scr: (Bb, H)     f32   recurrent state carried across time chunks
    """
    c_idx = pl.program_id(1)

    @pl.when(c_idx == 0)
    def _():
        h_scr[...] = jnp.zeros_like(h_scr)
        c_scr[...] = jnp.zeros_like(c_scr)

    H = hidden_size
    Tc, Bb, D = x_ref.shape

    # ---- Fused input projection for the whole chunk: one big MXU matmul. ----
    # Bb is a multiple of 8, so the (Tc, Bb, D) <-> (Tc*Bb, D) merges are layout-free.
    x2 = x_ref[...].reshape(Tc * Bb, D)                                    # bf16
    gx = jnp.dot(x2, w_ih_ref[...], preferred_element_type=jnp.float32)   # (Tc*Bb, 4H) f32
    gx_scr[...] = (gx + b_ref[...]).reshape(Tc, Bb, 4 * H)

    w_hh = w_hh_ref[...]                                                   # (H, 4H) bf16
    t0 = c_idx * chunk

    def step(t, carry):
        h_prev, c_prev = carry
        # Only the recurrent matmul sits on the serial critical path.
        gates = gx_scr[t] + jnp.dot(h_prev.astype(w_hh.dtype), w_hh,
                                    preferred_element_type=jnp.float32)   # (Bb, 4H) f32
        # PyTorch gate order [i, f, g, o].  With H a multiple of 128 these slices are
        # whole lane tiles (free ref views); at the tiny demo H they are lane sub-slices.
        i_g = jax.nn.sigmoid(gates[:, 0 * H:1 * H])
        f_g = jax.nn.sigmoid(gates[:, 1 * H:2 * H])
        g_g = jnp.tanh(gates[:, 2 * H:3 * H])
        o_g = jax.nn.sigmoid(gates[:, 3 * H:4 * H])
        # 3 sigmoid + 2 tanh per step land on the single-issue EUP (the per-step limit at
        # large B*H); keep the rest on the VPU and let the unrolled loop interleave EUP
        # work of step t+1 under the MXU latency of step t.
        c_new = f_g * c_prev + i_g * g_g
        h_new = o_g * jnp.tanh(c_new)
        if ragged:  # mask trailing steps of a ragged final chunk
            valid = (t0 + t) < seq_len
            h_new = jnp.where(valid, h_new, h_prev)
            c_new = jnp.where(valid, c_new, c_prev)
        return h_new, c_new

    # Unrolled so the LLO scheduler can overlap the h@W_hh MXU push, EUP sigmoid/tanh and
    # VPU gate math across timesteps.
    h_last, c_last = jax.lax.fori_loop(0, chunk, step, (h_scr[...], c_scr[...]),
                                       unroll=unroll)
    h_scr[...] = h_last
    c_scr[...] = c_last
    # Cheap (Bb, H) VMEM copy each chunk; the HBM writeback only happens once per batch
    # shard (when the output block index changes) — no reliance on revisit semantics.
    h_out_ref[...] = h_last
    # TODO(synk): for very large H, keep W_hh resident in MXU weight registers across the
    # chunk via pltpu.matmul_push_rhs/matmul_acc_lhs instead of jnp.dot re-pushing it.


def _round_up(x, m):
    return (x + m - 1) // m * m


def _pick_batch_block(b_pad):
    """Split batch across TensorCores (v7x has 2) when big enough; shards stay %8 == 0."""
    if b_pad >= 16 and (b_pad // 2) % 8 == 0:
        return b_pad // 2
    return b_pad


def _vmem_capacity_bytes():
    try:
        return int(pltpu.get_tpu_info().vmem_capacity_bytes)
    except Exception:
        return 64 << 20   # conservative default (v7x per-TensorCore VMEM)


def _pick_time_chunk(T, Bb, D, H, budget_bytes):
    """Largest chunk whose per-chunk VMEM (f32 gx scratch + double-buffered bf16 x) fits."""
    per_step = Bb * (4 * H * 4 + 2 * D * 2)
    return int(max(1, min(T, budget_bytes // max(1, per_step))))


def lstm_critic_forward(state, params):
    """state: (B, T, D) float32 (batch_first, like PyTorch). Returns value: (B, 1) f32."""
    B, T, D = state.shape
    H = params["w_hh"].shape[0]            # w_hh stored as (H, 4H)

    # Pad batch to a multiple of 8 sublanes so every (B, .) vreg/tile is full.
    B_pad = _round_up(B, 8)
    if B_pad != B:
        state = jnp.pad(state, ((0, B_pad - B), (0, 0), (0, 0)))

    # Time-major bf16 input: the only HBM-resident activation the kernel streams
    # (the f32 gate slab of v2 no longer exists in HBM).
    x_tm = jnp.transpose(state, (1, 0, 2)).astype(jnp.bfloat16)     # (T, B_pad, D)

    w_ih = params["w_ih"].astype(jnp.bfloat16)                      # (D, 4H)
    w_hh = params["w_hh"].astype(jnp.bfloat16)                      # (H, 4H)
    bias = params["b"]                                              # (1, 4H) f32

    Bb = _pick_batch_block(B_pad)
    nb = B_pad // Bb

    # Generation-aware budgets: v6e (128 MiB VMEM) takes big chunks; v7x (64 MiB) and v5e
    # stay conservative.  Weights are single-buffered whole-array VMEM residents.
    vmem_cap = _vmem_capacity_bytes()
    weights_bytes = (D * 4 * H + H * 4 * H) * 2 + 4 * H * 4
    chunk_budget = max(1 << 20, vmem_cap // 4 - weights_bytes)
    Tc = _pick_time_chunk(T, Bb, D, H, chunk_budget)
    num_chunks = -(-T // Tc)
    ragged = (num_chunks * Tc != T)
    unroll = True if Tc <= 32 else 8

    # Explicit scoped-VMEM limit (v5e's 16 MiB default would otherwise be the binding limit).
    vmem_limit = int(min(vmem_cap * 3 // 4, 100 << 20))

    kernel = functools.partial(_lstm_fused_kernel, hidden_size=H, chunk=Tc,
                               seq_len=T, ragged=ragged, unroll=unroll)

    h_last = pl.pallas_call(
        kernel,
        out_shape=jax.ShapeDtypeStruct((B_pad, H), jnp.float32),
        grid_spec=pltpu.PrefetchScalarGridSpec(
            num_scalar_prefetch=0,
            grid=(nb, num_chunks),
            in_specs=[
                # Streamed, double-buffered bf16 input chunk.
                pl.BlockSpec((Tc, Bb, D), lambda b, c: (c, b, 0)),
                # Loop-invariant weights: whole-array, single-buffered VMEM residents
                # (no per-chunk re-DMA, no wasted double-buffer on v7x's 64 MiB VMEM).
                pl.BlockSpec(memory_space=pltpu.MemorySpace.VMEM),
                pl.BlockSpec(memory_space=pltpu.MemorySpace.VMEM),
                pl.BlockSpec(memory_space=pltpu.MemorySpace.VMEM),
            ],
            out_specs=pl.BlockSpec((Bb, H), lambda b, c: (b, 0)),
            scratch_shapes=[
                pltpu.VMEM((Tc, Bb, 4 * H), jnp.float32),   # per-chunk gate slab
                pltpu.VMEM((Bb, H), jnp.float32),           # h carried across chunks
                pltpu.VMEM((Bb, H), jnp.float32),           # c carried across chunks
            ],
        ),
        compiler_params=pltpu.CompilerParams(
            # Batch shards are independent (megacore-parallel on v7x); the time axis is the
            # serial recurrence.
            dimension_semantics=("parallel", "arbitrary"),
            vmem_limit_bytes=vmem_limit,
        ),
    )(x_tm, w_ih, bias, w_hh)

    # Tiny (H, 1) value head in XLA: keeps the kernel output lane-dense and avoids an N=1
    # MXU push + masked (B, 1) partial store on the serial path.
    return h_last[:B] @ params["w_v"] + params["b_v"]


def init_params(key, input_dims, hidden_size):
    """Deterministic init mimicking PyTorch uniform(-1/sqrt(H), 1/sqrt(H))."""
    k = jax.random.split(key, 6)
    bound = 1.0 / jnp.sqrt(hidden_size)
    H, D = hidden_size, input_dims
    w_ih = jax.random.uniform(k[0], (4 * H, D), jnp.float32, -bound, bound)
    w_hh = jax.random.uniform(k[1], (4 * H, H), jnp.float32, -bound, bound)
    b_ih = jax.random.uniform(k[2], (4 * H,), jnp.float32, -bound, bound)
    b_hh = jax.random.uniform(k[3], (4 * H,), jnp.float32, -bound, bound)
    w_v = jax.random.uniform(k[4], (1, H), jnp.float32, -bound, bound)
    b_v = jax.random.uniform(k[5], (1,), jnp.float32, -bound, bound)
    return {
        "w_ih": w_ih.T,                          # (D, 4H)
        "w_hh": w_hh.T,                          # (H, 4H)
        "b": (b_ih + b_hh).reshape(1, 4 * H),    # (1, 4H)
        "w_v": w_v.T,                            # (H, 1)
        "b_v": b_v.reshape(1, 1),                # (1, 1)
    }


def reference_forward(state, params):
    """Pure-JAX f32 reference (lax.scan) matching PyTorch nn.LSTM semantics."""
    B, T, D = state.shape
    H = params["w_hh"].shape[0]
    x_tm = jnp.transpose(state, (1, 0, 2)).astype(jnp.float32)

    def step(carry, x_t):
        h, c = carry
        gates = x_t @ params["w_ih"] + h @ params["w_hh"] + params["b"]
        i = jax.nn.sigmoid(gates[:, 0 * H:1 * H])
        f = jax.nn.sigmoid(gates[:, 1 * H:2 * H])
        g = jnp.tanh(gates[:, 2 * H:3 * H])
        o = jax.nn.sigmoid(gates[:, 3 * H:4 * H])
        c_new = f * c + i * g
        h_new = o * jnp.tanh(c_new)
        return (h_new, c_new), None

    h0 = jnp.zeros((B, H), jnp.float32)
    c0 = jnp.zeros((B, H), jnp.float32)
    (h_last, _), _ = jax.lax.scan(step, (h0, c0), x_tm)
    return h_last @ params["w_v"] + params["b_v"]


if __name__ == "__main__":
    B, T, D, H = 4, 8, 16, 32

    key = jax.random.PRNGKey(0)
    k_state, k_params = jax.random.split(key)
    state = jax.random.normal(k_state, (B, T, D), jnp.float32)
    params = init_params(k_params, input_dims=D, hidden_size=H)

    value = jax.jit(lstm_critic_forward)(state, params)
    value = jax.block_until_ready(value)

    ref = reference_forward(state, params)
    assert value.shape == (B, 1)
    # Tolerance accounts for bf16 operands in both the input-projection and the recurrent
    # matmuls (f32 accumulation, f32 gate math); drift grows with T — validate at
    # production sequence lengths before tightening.
    assert jnp.allclose(value, ref, atol=3e-2, rtol=3e-2), (value, ref)

    print("KERNEL_OK")
</pallas_src>

<mosaic_0001>
module attributes {stable_mosaic.version = 11 : i64} {
  func.func @_lstm_fused_kernel(%arg0: i32, %arg1: i32, %arg2: memref<8x8x16xbf16, #tpu.memory_space<vmem>>, %arg3: memref<16x128xbf16, #tpu.memory_space<vmem>>, %arg4: memref<1x128xf32, #tpu.memory_space<vmem>>, %arg5: memref<32x128xbf16, #tpu.memory_space<vmem>>, %arg6: memref<8x32xf32, #tpu.memory_space<vmem>>, %arg7: memref<8x8x128xf32, #tpu.memory_space<vmem>>, %arg8: memref<8x32xf32, #tpu.memory_space<vmem>>, %arg9: memref<8x32xf32, #tpu.memory_space<vmem>>) attributes {dimension_semantics = [#tpu.dimension_semantics<parallel>, #tpu.dimension_semantics<arbitrary>], iteration_bounds = array<i64: 1, 1>, scalar_prefetch = 0 : i64, scratch_operands = 3 : i64, tpu.core_type = #tpu.core_type<tc>, window_params = [{transform_indices = @transform_0, window_bounds = array<i64: 8, 8, 16>}, {pipeline_mode = #tpu.pipeline_mode<synchronous>, transform_indices = @transform_1, window_bounds = array<i64: 16, 128>}, {pipeline_mode = #tpu.pipeline_mode<synchronous>, transform_indices = @transform_2, window_bounds = array<i64: 1, 128>}, {pipeline_mode = #tpu.pipeline_mode<synchronous>, transform_indices = @transform_3, window_bounds = array<i64: 32, 128>}, {transform_indices = @transform_4, window_bounds = array<i64: 8, 32>}]} {
    %c0_i32 = arith.constant 0 : i32
    %0 = arith.cmpi eq, %arg1, %c0_i32 : i32
    %1 = arith.extui %0 : i1 to i32
    %c0_i32_0 = arith.constant 0 : i32
    %2 = arith.cmpi ne, %1, %c0_i32_0 : i32
    scf.if %2 {
      %cst_71 = arith.constant 0.000000e+00 : f32
      %266 = vector.broadcast %cst_71 : f32 to vector<8x32xf32>
      %c0_72 = arith.constant 0 : index
      %c0_73 = arith.constant 0 : index
      %267 = vector.load %arg8[%c0_72, %c0_73] : memref<8x32xf32, #tpu.memory_space<vmem>>, vector<8x32xf32>
      tpu.vector_store %arg8[%c0_72, %c0_73], %266 {strides = array<i32>} : memref<8x32xf32, #tpu.memory_space<vmem>>, vector<8x32xf32>,
      %cst_74 = arith.constant 0.000000e+00 : f32
      %268 = vector.broadcast %cst_74 : f32 to vector<8x32xf32>
      %c0_75 = arith.constant 0 : index
      %c0_76 = arith.constant 0 : index
      %269 = vector.load %arg9[%c0_75, %c0_76] : memref<8x32xf32, #tpu.memory_space<vmem>>, vector<8x32xf32>
      tpu.vector_store %arg9[%c0_75, %c0_76], %268 {strides = array<i32>} : memref<8x32xf32, #tpu.memory_space<vmem>>, vector<8x32xf32>,
    } else {
    }
    %c0 = arith.constant 0 : index
    %c0_1 = arith.constant 0 : index
    %c0_2 = arith.constant 0 : index
    %3 = vector.load %arg2[%c0, %c0_1, %c0_2] : memref<8x8x16xbf16, #tpu.memory_space<vmem>>, vector<8x8x16xbf16>
    %4 = vector.shape_cast %3 : vector<8x8x16xbf16> to vector<64x16xbf16>
    %c0_3 = arith.constant 0 : index
    %c0_4 = arith.constant 0 : index
    %5 = vector.load %arg3[%c0_3, %c0_4] : memref<16x128xbf16, #tpu.memory_space<vmem>>, vector<16x128xbf16>
    %cst = arith.constant dense<0.000000e+00> : vector<64x128xf32>
    %6 = tpu.matmul %4, %5, %cst {dimension_numbers = #tpu.dot_dimension_numbers<[1], [0], [0], [1], [0, 0, 1, 1], [], []>} : vector<64x16xbf16>, vector<16x128xbf16>, vector<64x128xf32> -> vector<64x128xf32>
    %c0_5 = arith.constant 0 : index
    %c0_6 = arith.constant 0 : index
    %7 = vector.load %arg4[%c0_5, %c0_6] : memref<1x128xf32, #tpu.memory_space<vmem>>, vector<1x128xf32>
    %8 = vector.broadcast %7 : vector<1x128xf32> to vector<64x128xf32>
    %9 = arith.addf %6, %8 : vector<64x128xf32>
    %10 = vector.shape_cast %9 : vector<64x128xf32> to vector<8x8x128xf32>
    %c0_7 = arith.constant 0 : index
    %c0_8 = arith.constant 0 : index
    %c0_9 = arith.constant 0 : index
    %11 = vector.load %arg7[%c0_7, %c0_8, %c0_9] : memref<8x8x128xf32, #tpu.memory_space<vmem>>, vector<8x8x128xf32>
    tpu.vector_store %arg7[%c0_7, %c0_8, %c0_9], %10 {strides = array<i32>} : memref<8x8x128xf32, #tpu.memory_space<vmem>>, vector<8x8x128xf32>,
    %c0_10 = arith.constant 0 : index
    %c0_11 = arith.constant 0 : index
    %12 = vector.load %arg5[%c0_10, %c0_11] : memref<32x128xbf16, #tpu.memory_space<vmem>>, vector<32x128xbf16>
    %c0_12 = arith.constant 0 : index
    %c0_13 = arith.constant 0 : index
    %13 = vector.load %arg8[%c0_12, %c0_13] : memref<8x32xf32, #tpu.memory_space<vmem>>, vector<8x32xf32>
    %c0_14 = arith.constant 0 : index
    %c0_15 = arith.constant 0 : index
    %14 = vector.load %arg9[%c0_14, %c0_15] : memref<8x32xf32, #tpu.memory_space<vmem>>, vector<8x32xf32>
    %c0_i32_16 = arith.constant 0 : i32
    %15 = arith.index_cast %c0_i32_16 : i32 to index
    %c0_17 = arith.constant 0 : index
    %c0_18 = arith.constant 0 : index
    %16 = vector.load %arg7[%15, %c0_17, %c0_18] : memref<8x8x128xf32, #tpu.memory_space<vmem>>, vector<1x8x128xf32>
    %17 = vector.shape_cast %16 : vector<1x8x128xf32> to vector<8x128xf32>
    %18 = arith.truncf %13 : vector<8x32xf32> to vector<8x32xbf16>
    %cst_19 = arith.constant dense<0.000000e+00> : vector<8x128xf32>
    %19 = tpu.matmul %18, %12, %cst_19 {dimension_numbers = #tpu.dot_dimension_numbers<[1], [0], [0], [1], [0, 0, 1, 1], [], []>} : vector<8x32xbf16>, vector<32x128xbf16>, vector<8x128xf32> -> vector<8x128xf32>
    %20 = arith.addf %17, %19 : vector<8x128xf32>
    %21 = vector.extract_strided_slice %20 {offsets = [0, 0], sizes = [8, 32], strides = [1, 1]} : vector<8x128xf32> to vector<8x32xf32>
    %22 = arith.negf %21 : vector<8x32xf32>
    %23 = math.exp %22 : vector<8x32xf32>
    %cst_20 = arith.constant 1.000000e+00 : f32
    %24 = vector.broadcast %cst_20 : f32 to vector<8x32xf32>
    %25 = arith.addf %24, %23 : vector<8x32xf32>
    %26 = arith.divf %24, %25 : vector<8x32xf32>
    %27 = vector.extract_strided_slice %20 {offsets = [0, 32], sizes = [8, 32], strides = [1, 1]} : vector<8x128xf32> to vector<8x32xf32>
    %28 = arith.negf %27 : vector<8x32xf32>
    %29 = math.exp %28 : vector<8x32xf32>
    %cst_21 = arith.constant 1.000000e+00 : f32
    %30 = vector.broadcast %cst_21 : f32 to vector<8x32xf32>
    %31 = arith.addf %30, %29 : vector<8x32xf32>
    %32 = arith.divf %30, %31 : vector<8x32xf32>
    %33 = vector.extract_strided_slice %20 {offsets = [0, 64], sizes = [8, 32], strides = [1, 1]} : vector<8x128xf32> to vector<8x32xf32>
    %34 = math.tanh %33 : vector<8x32xf32>
    %35 = vector.extract_strided_slice %20 {offsets = [0, 96], sizes = [8, 32], strides = [1, 1]} : vector<8x128xf32> to vector<8x32xf32>
    %36 = arith.negf %35 : vector<8x32xf32>
    %37 = math.exp %36 : vector<8x32xf32>
    %cst_22 = arith.constant 1.000000e+00 : f32
    %38 = vector.broadcast %cst_22 : f32 to vector<8x32xf32>
    %39 = arith.addf %38, %37 : vector<8x32xf32>
    %40 = arith.divf %38, %39 : vector<8x32xf32>
    %41 = arith.mulf %32, %14 : vector<8x32xf32>
    %42 = arith.mulf %26, %34 : vector<8x32xf32>
    %43 = arith.addf %41, %42 : vector<8x32xf32>
    %44 = math.tanh %43 : vector<8x32xf32>
    %45 = arith.mulf %40, %44 : vector<8x32xf32>
    %c1_i32 = arith.constant 1 : i32
    %46 = arith.index_cast %c1_i32 : i32 to index
    %c0_23 = arith.constant 0 : index
    %c0_24 = arith.constant 0 : index
    %47 = vector.load %arg7[%46, %c0_23, %c0_24] : memref<8x8x128xf32, #tpu.memory_space<vmem>>, vector<1x8x128xf32>
    %48 = vector.shape_cast %47 : vector<1x8x128xf32> to vector<8x128xf32>
    %49 = arith.truncf %45 : vector<8x32xf32> to vector<8x32xbf16>
    %cst_25 = arith.constant dense<0.000000e+00> : vector<8x128xf32>
    %50 = tpu.matmul %49, %12, %cst_25 {dimension_numbers = #tpu.dot_dimension_numbers<[1], [0], [0], [1], [0, 0, 1, 1], [], []>} : vector<8x32xbf16>, vector<32x128xbf16>, vector<8x128xf32> -> vector<8x128xf32>
    %51 = arith.addf %48, %50 : vector<8x128xf32>
    %52 = vector.extract_strided_slice %51 {offsets = [0, 0], sizes = [8, 32], strides = [1, 1]} : vector<8x128xf32> to vector<8x32xf32>
    %53 = arith.negf %52 : vector<8x32xf32>
    %54 = math.exp %53 : vector<8x32xf32>
    %cst_26 = arith.constant 1.000000e+00 : f32
    %55 = vector.broadcast %cst_26 : f32 to vector<8x32xf32>
    %56 = arith.addf %55, %54 : vector<8x32xf32>
    %57 = arith.divf %55, %56 : vector<8x32xf32>
    %58 = vector.extract_strided_slice %51 {offsets = [0, 32], sizes = [8, 32], strides = [1, 1]} : vector<8x128xf32> to vector<8x32xf32>
    %59 = arith.negf %58 : vector<8x32xf32>
    %60 = math.exp %59 : vector<8x32xf32>
    %cst_27 = arith.constant 1.000000e+00 : f32
    %61 = vector.broadcast %cst_27 : f32 to vector<8x32xf32>
    %62 = arith.addf %61, %60 : vector<8x32xf32>
    %63 = arith.divf %61, %62 : vector<8x32xf32>
    %64 = vector.extract_strided_slice %51 {offsets = [0, 64], sizes = [8, 32], strides = [1, 1]} : vector<8x128xf32> to vector<8x32xf32>
    %65 = math.tanh %64 : vector<8x32xf32>
    %66 = vector.extract_strided_slice %51 {offsets = [0, 96], sizes = [8, 32], strides = [1, 1]} : vector<8x128xf32> to vector<8x32xf32>
    %67 = arith.negf %66 : vector<8x32xf32>
    %68 = math.exp %67 : vector<8x32xf32>
    %cst_28 = arith.constant 1.000000e+00 : f32
    %69 = vector.broadcast %cst_28 : f32 to vector<8x32xf32>
    %70 = arith.addf %69, %68 : vector<8x32xf32>
    %71 = arith.divf %69, %70 : vector<8x32xf32>
    %72 = arith.mulf %63, %43 : vector<8x32xf32>
    %73 = arith.mulf %57, %65 : vector<8x32xf32>
    %74 = arith.addf %72, %73 : vector<8x32xf32>
    %75 = math.tanh %74 : vector<8x32xf32>
    %76 = arith.mulf %71, %75 : vector<8x32xf32>
    %c2_i32 = arith.constant 2 : i32
    %77 = arith.index_cast %c2_i32 : i32 to index
    %c0_29 = arith.constant 0 : index
    %c0_30 = arith.constant 0 : index
    %78 = vector.load %arg7[%77, %c0_29, %c0_30] : memref<8x8x128xf32, #tpu.memory_space<vmem>>, vector<1x8x128xf32>
    %79 = vector.shape_cast %78 : vector<1x8x128xf32> to vector<8x128xf32>
    %80 = arith.truncf %76 : vector<8x32xf32> to vector<8x32xbf16>
    %cst_31 = arith.constant dense<0.000000e+00> : vector<8x128xf32>
    %81 = tpu.matmul %80, %12, %cst_31 {dimension_numbers = #tpu.dot_dimension_numbers<[1], [0], [0], [1], [0, 0, 1, 1], [], []>} : vector<8x32xbf16>, vector<32x128xbf16>, vector<8x128xf32> -> vector<8x128xf32>
    %82 = arith.addf %79, %81 : vector<8x128xf32>
    %83 = vector.extract_strided_slice %82 {offsets = [0, 0], sizes = [8, 32], strides = [1, 1]} : vector<8x128xf32> to vector<8x32xf32>
    %84 = arith.negf %83 : vector<8x32xf32>
    %85 = math.exp %84 : vector<8x32xf32>
    %cst_32 = arith.constant 1.000000e+00 : f32
    %86 = vector.broadcast %cst_32 : f32 to vector<8x32xf32>
    %87 = arith.addf %86, %85 : vector<8x32xf32>
    %88 = arith.divf %86, %87 : vector<8x32xf32>
    %89 = vector.extract_strided_slice %82 {offsets = [0, 32], sizes = [8, 32], strides = [1, 1]} : vector<8x128xf32> to vector<8x32xf32>
    %90 = arith.negf %89 : vector<8x32xf32>
    %91 = math.exp %90 : vector<8x32xf32>
    %cst_33 = arith.constant 1.000000e+00 : f32
    %92 = vector.broadcast %cst_33 : f32 to vector<8x32xf32>
    %93 = arith.addf %92, %91 : vector<8x32xf32>
    %94 = arith.divf %92, %93 : vector<8x32xf32>
    %95 = vector.extract_strided_slice %82 {offsets = [0, 64], sizes = [8, 32], strides = [1, 1]} : vector<8x128xf32> to vector<8x32xf32>
    %96 = math.tanh %95 : vector<8x32xf32>
    %97 = vector.extract_strided_slice %82 {offsets = [0, 96], sizes = [8, 32], strides = [1, 1]} : vector<8x128xf32> to vector<8x32xf32>
    %98 = arith.negf %97 : vector<8x32xf32>
    %99 = math.exp %98 : vector<8x32xf32>
    %cst_34 = arith.constant 1.000000e+00 : f32
    %100 = vector.broadcast %cst_34 : f32 to vector<8x32xf32>
    %101 = arith.addf %100, %99 : vector<8x32xf32>
    %102 = arith.divf %100, %101 : vector<8x32xf32>
    %103 = arith.mulf %94, %74 : vector<8x32xf32>
    %104 = arith.mulf %88, %96 : vector<8x32xf32>
    %105 = arith.addf %103, %104 : vector<8x32xf32>
    %106 = math.tanh %105 : vector<8x32xf32>
    %107 = arith.mulf %102, %106 : vector<8x32xf32>
    %c3_i32 = arith.constant 3 : i32
    %108 = arith.index_cast %c3_i32 : i32 to index
    %c0_35 = arith.constant 0 : index
    %c0_36 = arith.constant 0 : index
    %109 = vector.load %arg7[%108, %c0_35, %c0_36] : memref<8x8x128xf32, #tpu.memory_space<vmem>>, vector<1x8x128xf32>
    %110 = vector.shape_cast %109 : vector<1x8x128xf32> to vector<8x128xf32>
    %111 = arith.truncf %107 : vector<8x32xf32> to vector<8x32xbf16>
    %cst_37 = arith.constant dense<0.000000e+00> : vector<8x128xf32>
    %112 = tpu.matmul %111, %12, %cst_37 {dimension_numbers = #tpu.dot_dimension_numbers<[1], [0], [0], [1], [0, 0, 1, 1], [], []>} : vector<8x32xbf16>, vector<32x128xbf16>, vector<8x128xf32> -> vector<8x128xf32>
    %113 = arith.addf %110, %112 : vector<8x128xf32>
    %114 = vector.extract_strided_slice %113 {offsets = [0, 0], sizes = [8, 32], strides = [1, 1]} : vector<8x128xf32> to vector<8x32xf32>
    %115 = arith.negf %114 : vector<8x32xf32>
    %116 = math.exp %115 : vector<8x32xf32>
    %cst_38 = arith.constant 1.000000e+00 : f32
    %117 = vector.broadcast %cst_38 : f32 to vector<8x32xf32>
    %118 = arith.addf %117, %116 : vector<8x32xf32>
    %119 = arith.divf %117, %118 : vector<8x32xf32>
    %120 = vector.extract_strided_slice %113 {offsets = [0, 32], sizes = [8, 32], strides = [1, 1]} : vector<8x128xf32> to vector<8x32xf32>
    %121 = arith.negf %120 : vector<8x32xf32>
    %122 = math.exp %121 : vector<8x32xf32>
    %cst_39 = arith.constant 1.000000e+00 : f32
    %123 = vector.broadcast %cst_39 : f32 to vector<8x32xf32>
    %124 = arith.addf %123, %122 : vector<8x32xf32>
    %125 = arith.divf %123, %124 : vector<8x32xf32>
    %126 = vector.extract_strided_slice %113 {offsets = [0, 64], sizes = [8, 32], strides = [1, 1]} : vector<8x128xf32> to vector<8x32xf32>
    %127 = math.tanh %126 : vector<8x32xf32>
    %128 = vector.extract_strided_slice %113 {offsets = [0, 96], sizes = [8, 32], strides = [1, 1]} : vector<8x128xf32> to vector<8x32xf32>
    %129 = arith.negf %128 : vector<8x32xf32>
    %130 = math.exp %129 : vector<8x32xf32>
    %cst_40 = arith.constant 1.000000e+00 : f32
    %131 = vector.broadcast %cst_40 : f32 to vector<8x32xf32>
    %132 = arith.addf %131, %130 : vector<8x32xf32>
    %133 = arith.divf %131, %132 : vector<8x32xf32>
    %134 = arith.mulf %125, %105 : vector<8x32xf32>
    %135 = arith.mulf %119, %127 : vector<8x32xf32>
    %136 = arith.addf %134, %135 : vector<8x32xf32>
    %137 = math.tanh %136 : vector<8x32xf32>
    %138 = arith.mulf %133, %137 : vector<8x32xf32>
    %c4_i32 = arith.constant 4 : i32
    %139 = arith.index_cast %c4_i32 : i32 to index
    %c0_41 = arith.constant 0 : index
    %c0_42 = arith.constant 0 : index
    %140 = vector.load %arg7[%139, %c0_41, %c0_42] : memref<8x8x128xf32, #tpu.memory_space<vmem>>, vector<1x8x128xf32>
    %141 = vector.shape_cast %140 : vector<1x8x128xf32> to vector<8x128xf32>
    %142 = arith.truncf %138 : vector<8x32xf32> to vector<8x32xbf16>
    %cst_43 = arith.constant dense<0.000000e+00> : vector<8x128xf32>
    %143 = tpu.matmul %142, %12, %cst_43 {dimension_numbers = #tpu.dot_dimension_numbers<[1], [0], [0], [1], [0, 0, 1, 1], [], []>} : vector<8x32xbf16>, vector<32x128xbf16>, vector<8x128xf32> -> vector<8x128xf32>
    %144 = arith.addf %141, %143 : vector<8x128xf32>
    %145 = vector.extract_strided_slice %144 {offsets = [0, 0], sizes = [8, 32], strides = [1, 1]} : vector<8x128xf32> to vector<8x32xf32>
    %146 = arith.negf %145 : vector<8x32xf32>
    %147 = math.exp %146 : vector<8x32xf32>
    %cst_44 = arith.constant 1.000000e+00 : f32
    %148 = vector.broadcast %cst_44 : f32 to vector<8x32xf32>
    %149 = arith.addf %148, %147 : vector<8x32xf32>
    %150 = arith.divf %148, %149 : vector<8x32xf32>
    %151 = vector.extract_strided_slice %144 {offsets = [0, 32], sizes = [8, 32], strides = [1, 1]} : vector<8x128xf32> to vector<8x32xf32>
    %152 = arith.negf %151 : vector<8x32xf32>
    %153 = math.exp %152 : vector<8x32xf32>
    %cst_45 = arith.constant 1.000000e+00 : f32
    %154 = vector.broadcast %cst_45 : f32 to vector<8x32xf32>
    %155 = arith.addf %154, %153 : vector<8x32xf32>
    %156 = arith.divf %154, %155 : vector<8x32xf32>
    %157 = vector.extract_strided_slice %144 {offsets = [0, 64], sizes = [8, 32], strides = [1, 1]} : vector<8x128xf32> to vector<8x32xf32>
    %158 = math.tanh %157 : vector<8x32xf32>
    %159 = vector.extract_strided_slice %144 {offsets = [0, 96], sizes = [8, 32], strides = [1, 1]} : vector<8x128xf32> to vector<8x32xf32>
    %160 = arith.negf %159 : vector<8x32xf32>
    %161 = math.exp %160 : vector<8x32xf32>
    %cst_46 = arith.constant 1.000000e+00 : f32
    %162 = vector.broadcast %cst_46 : f32 to vector<8x32xf32>
    %163 = arith.addf %162, %161 : vector<8x32xf32>
    %164 = arith.divf %162, %163 : vector<8x32xf32>
    %165 = arith.mulf %156, %136 : vector<8x32xf32>
    %166 = arith.mulf %150, %158 : vector<8x32xf32>
    %167 = arith.addf %165, %166 : vector<8x32xf32>
    %168 = math.tanh %167 : vector<8x32xf32>
    %169 = arith.mulf %164, %168 : vector<8x32xf32>
    %c5_i32 = arith.constant 5 : i32
    %170 = arith.index_cast %c5_i32 : i32 to index
    %c0_47 = arith.constant 0 : index
    %c0_48 = arith.constant 0 : index
    %171 = vector.load %arg7[%170, %c0_47, %c0_48] : memref<8x8x128xf32, #tpu.memory_space<vmem>>, vector<1x8x128xf32>
    %172 = vector.shape_cast %171 : vector<1x8x128xf32> to vector<8x128xf32>
    %173 = arith.truncf %169 : vector<8x32xf32> to vector<8x32xbf16>
    %cst_49 = arith.constant dense<0.000000e+00> : vector<8x128xf32>
    %174 = tpu.matmul %173, %12, %cst_49 {dimension_numbers = #tpu.dot_dimension_numbers<[1], [0], [0], [1], [0, 0, 1, 1], [], []>} : vector<8x32xbf16>, vector<32x128xbf16>, vector<8x128xf32> -> vector<8x128xf32>
    %175 = arith.addf %172, %174 : vector<8x128xf32>
    %176 = vector.extract_strided_slice %175 {offsets = [0, 0], sizes = [8, 32], strides = [1, 1]} : vector<8x128xf32> to vector<8x32xf32>
    %177 = arith.negf %176 : vector<8x32xf32>
    %178 = math.exp %177 : vector<8x32xf32>
    %cst_50 = arith.constant 1.000000e+00 : f32
    %179 = vector.broadcast %cst_50 : f32 to vector<8x32xf32>
    %180 = arith.addf %179, %178 : vector<8x32xf32>
    %181 = arith.divf %179, %180 : vector<8x32xf32>
    %182 = vector.extract_strided_slice %175 {offsets = [0, 32], sizes = [8, 32], strides = [1, 1]} : vector<8x128xf32> to vector<8x32xf32>
    %183 = arith.negf %182 : vector<8x32xf32>
    %184 = math.exp %183 : vector<8x32xf32>
    %cst_51 = arith.constant 1.000000e+00 : f32
    %185 = vector.broadcast %cst_51 : f32 to vector<8x32xf32>
    %186 = arith.addf %185, %184 : vector<8x32xf32>
    %187 = arith.divf %185, %186 : vector<8x32xf32>
    %188 = vector.extract_strided_slice %175 {offsets = [0, 64], sizes = [8, 32], strides = [1, 1]} : vector<8x128xf32> to vector<8x32xf32>
    %189 = math.tanh %188 : vector<8x32xf32>
    %190 = vector.extract_strided_slice %175 {offsets = [0, 96], sizes = [8, 32], strides = [1, 1]} : vector<8x128xf32> to vector<8x32xf32>
    %191 = arith.negf %190 : vector<8x32xf32>
    %192 = math.exp %191 : vector<8x32xf32>
    %cst_52 = arith.constant 1.000000e+00 : f32
    %193 = vector.broadcast %cst_52 : f32 to vector<8x32xf32>
    %194 = arith.addf %193, %192 : vector<8x32xf32>
    %195 = arith.divf %193, %194 : vector<8x32xf32>
    %196 = arith.mulf %187, %167 : vector<8x32xf32>
    %197 = arith.mulf %181, %189 : vector<8x32xf32>
    %198 = arith.addf %196, %197 : vector<8x32xf32>
    %199 = math.tanh %198 : vector<8x32xf32>
    %200 = arith.mulf %195, %199 : vector<8x32xf32>
    %c6_i32 = arith.constant 6 : i32
    %201 = arith.index_cast %c6_i32 : i32 to index
    %c0_53 = arith.constant 0 : index
    %c0_54 = arith.constant 0 : index
    %202 = vector.load %arg7[%201, %c0_53, %c0_54] : memref<8x8x128xf32, #tpu.memory_space<vmem>>, vector<1x8x128xf32>
    %203 = vector.shape_cast %202 : vector<1x8x128xf32> to vector<8x128xf32>
    %204 = arith.truncf %200 : vector<8x32xf32> to vector<8x32xbf16>
    %cst_55 = arith.constant dense<0.000000e+00> : vector<8x128xf32>
    %205 = tpu.matmul %204, %12, %cst_55 {dimension_numbers = #tpu.dot_dimension_numbers<[1], [0], [0], [1], [0, 0, 1, 1], [], []>} : vector<8x32xbf16>, vector<32x128xbf16>, vector<8x128xf32> -> vector<8x128xf32>
    %206 = arith.addf %203, %205 : vector<8x128xf32>
    %207 = vector.extract_strided_slice %206 {offsets = [0, 0], sizes = [8, 32], strides = [1, 1]} : vector<8x128xf32> to vector<8x32xf32>
    %208 = arith.negf %207 : vector<8x32xf32>
    %209 = math.exp %208 : vector<8x32xf32>
    %cst_56 = arith.constant 1.000000e+00 : f32
    %210 = vector.broadcast %cst_56 : f32 to vector<8x32xf32>
    %211 = arith.addf %210, %209 : vector<8x32xf32>
    %212 = arith.divf %210, %211 : vector<8x32xf32>
    %213 = vector.extract_strided_slice %206 {offsets = [0, 32], sizes = [8, 32], strides = [1, 1]} : vector<8x128xf32> to vector<8x32xf32>
    %214 = arith.negf %213 : vector<8x32xf32>
    %215 = math.exp %214 : vector<8x32xf32>
    %cst_57 = arith.constant 1.000000e+00 : f32
    %216 = vector.broadcast %cst_57 : f32 to vector<8x32xf32>
    %217 = arith.addf %216, %215 : vector<8x32xf32>
    %218 = arith.divf %216, %217 : vector<8x32xf32>
    %219 = vector.extract_strided_slice %206 {offsets = [0, 64], sizes = [8, 32], strides = [1, 1]} : vector<8x128xf32> to vector<8x32xf32>
    %220 = math.tanh %219 : vector<8x32xf32>
    %221 = vector.extract_strided_slice %206 {offsets = [0, 96], sizes = [8, 32], strides = [1, 1]} : vector<8x128xf32> to vector<8x32xf32>
    %222 = arith.negf %221 : vector<8x32xf32>
    %223 = math.exp %222 : vector<8x32xf32>
    %cst_58 = arith.constant 1.000000e+00 : f32
    %224 = vector.broadcast %cst_58 : f32 to vector<8x32xf32>
    %225 = arith.addf %224, %223 : vector<8x32xf32>
    %226 = arith.divf %224, %225 : vector<8x32xf32>
    %227 = arith.mulf %218, %198 : vector<8x32xf32>
    %228 = arith.mulf %212, %220 : vector<8x32xf32>
    %229 = arith.addf %227, %228 : vector<8x32xf32>
    %230 = math.tanh %229 : vector<8x32xf32>
    %231 = arith.mulf %226, %230 : vector<8x32xf32>
    %c7_i32 = arith.constant 7 : i32
    %232 = arith.index_cast %c7_i32 : i32 to index
    %c0_59 = arith.constant 0 : index
    %c0_60 = arith.constant 0 : index
    %233 = vector.load %arg7[%232, %c0_59, %c0_60] : memref<8x8x128xf32, #tpu.memory_space<vmem>>, vector<1x8x128xf32>
    %234 = vector.shape_cast %233 : vector<1x8x128xf32> to vector<8x128xf32>
    %235 = arith.truncf %231 : vector<8x32xf32> to vector<8x32xbf16>
    %cst_61 = arith.constant dense<0.000000e+00> : vector<8x128xf32>
    %236 = tpu.matmul %235, %12, %cst_61 {dimension_numbers = #tpu.dot_dimension_numbers<[1], [0], [0], [1], [0, 0, 1, 1], [], []>} : vector<8x32xbf16>, vector<32x128xbf16>, vector<8x128xf32> -> vector<8x128xf32>
    %237 = arith.addf %234, %236 : vector<8x128xf32>
    %238 = vector.extract_strided_slice %237 {offsets = [0, 0], sizes = [8, 32], strides = [1, 1]} : vector<8x128xf32> to vector<8x32xf32>
    %239 = arith.negf %238 : vector<8x32xf32>
    %240 = math.exp %239 : vector<8x32xf32>
    %cst_62 = arith.constant 1.000000e+00 : f32
    %241 = vector.broadcast %cst_62 : f32 to vector<8x32xf32>
    %242 = arith.addf %241, %240 : vector<8x32xf32>
    %243 = arith.divf %241, %242 : vector<8x32xf32>
    %244 = vector.extract_strided_slice %237 {offsets = [0, 32], sizes = [8, 32], strides = [1, 1]} : vector<8x128xf32> to vector<8x32xf32>
    %245 = arith.negf %244 : vector<8x32xf32>
    %246 = math.exp %245 : vector<8x32xf32>
    %cst_63 = arith.constant 1.000000e+00 : f32
    %247 = vector.broadcast %cst_63 : f32 to vector<8x32xf32>
    %248 = arith.addf %247, %246 : vector<8x32xf32>
    %249 = arith.divf %247, %248 : vector<8x32xf32>
    %250 = vector.extract_strided_slice %237 {offsets = [0, 64], sizes = [8, 32], strides = [1, 1]} : vector<8x128xf32> to vector<8x32xf32>
    %251 = math.tanh %250 : vector<8x32xf32>
    %252 = vector.extract_strided_slice %237 {offsets = [0, 96], sizes = [8, 32], strides = [1, 1]} : vector<8x128xf32> to vector<8x32xf32>
    %253 = arith.negf %252 : vector<8x32xf32>
    %254 = math.exp %253 : vector<8x32xf32>
    %cst_64 = arith.constant 1.000000e+00 : f32
    %255 = vector.broadcast %cst_64 : f32 to vector<8x32xf32>
    %256 = arith.addf %255, %254 : vector<8x32xf32>
    %257 = arith.divf %255, %256 : vector<8x32xf32>
    %258 = arith.mulf %249, %229 : vector<8x32xf32>
    %259 = arith.mulf %243, %251 : vector<8x32xf32>
    %260 = arith.addf %258, %259 : vector<8x32xf32>
    %261 = math.tanh %260 : vector<8x32xf32>
    %262 = arith.mulf %257, %261 : vector<8x32xf32>
    %c8_i32 = arith.constant 8 : i32
    %c0_65 = arith.constant 0 : index
    %c0_66 = arith.constant 0 : index
    %263 = vector.load %arg8[%c0_65, %c0_66] : memref<8x32xf32, #tpu.memory_space<vmem>>, vector<8x32xf32>
    tpu.vector_store %arg8[%c0_65, %c0_66], %262 {strides = array<i32>} : memref<8x32xf32, #tpu.memory_space<vmem>>, vector<8x32xf32>,
    %c0_67 = arith.constant 0 : index
    %c0_68 = arith.constant 0 : index
    %264 = vector.load %arg9[%c0_67, %c0_68] : memref<8x32xf32, #tpu.memory_space<vmem>>, vector<8x32xf32>
    tpu.vector_store %arg9[%c0_67, %c0_68], %260 {strides = array<i32>} : memref<8x32xf32, #tpu.memory_space<vmem>>, vector<8x32xf32>,
    %c0_69 = arith.constant 0 : index
    %c0_70 = arith.constant 0 : index
    %265 = vector.load %arg6[%c0_69, %c0_70] : memref<8x32xf32, #tpu.memory_space<vmem>>, vector<8x32xf32>
    tpu.vector_store %arg6[%c0_69, %c0_70], %262 {strides = array<i32>} : memref<8x32xf32, #tpu.memory_space<vmem>>, vector<8x32xf32>,
    return
  }
  func.func @transform_0(%arg0: i32, %arg1: i32) -> (i32, i32, i32) {
    %c0_i32 = arith.constant 0 : i32
    %c0_i32_0 = arith.constant 0 : i32
    return %arg1, %arg0, %c0_i32 : i32, i32, i32
  }
  func.func @transform_1(%arg0: i32, %arg1: i32) -> (i32, i32) {
    %c0_i32 = arith.constant 0 : i32
    %c0_i32_0 = arith.constant 0 : i32
    %c0_i32_1 = arith.constant 0 : i32
    return %c0_i32, %c0_i32_0 : i32, i32
  }
  func.func @transform_2(%arg0: i32, %arg1: i32) -> (i32, i32) {
    %c0_i32 = arith.constant 0 : i32
    %c0_i32_0 = arith.constant 0 : i32
    %c0_i32_1 = arith.constant 0 : i32
    return %c0_i32, %c0_i32_0 : i32, i32
  }
  func.func @transform_3(%arg0: i32, %arg1: i32) -> (i32, i32) {
    %c0_i32 = arith.constant 0 : i32
    %c0_i32_0 = arith.constant 0 : i32
    %c0_i32_1 = arith.constant 0 : i32
    return %c0_i32, %c0_i32_0 : i32, i32
  }
  func.func @transform_4(%arg0: i32, %arg1: i32) -> (i32, i32) {
    %c0_i32 = arith.constant 0 : i32
    %c0_i32_0 = arith.constant 0 : i32
    return %arg0, %c0_i32 : i32, i32
  }
}

</mosaic_0001>

<bundles_post_ra>
// kernel: lstm_critic_forward.1
= control target key start
LH: loop header
LB: loop body
LE: loop exit
PB: predicated region body
PF: predicated region fallthrough
CT: control target
= control target key end

     0   :  { %vm22_vm0 = vcmask 261120   ;;  %v987_v0 = vmov 0.0   ;;  %vm988_vm1 = vmmov 0   ;;  %vm68_vm2 = vcmask 130048   ;;  %s989_s25 = smov 64   ;;  %s1176_s1 = inlined_call_operand.vmem [shape: bf16[16,128], index: 1, kind: input, shape index: {}]   ;;  %s1177_s3 = inlined_call_operand.vmem [shape: bf16[32,128], index: 3, kind: input, shape index: {}]   ;;  %s1178_s0 = inlined_call_operand.vmem [shape: bf16[8,8,16], index: 0, kind: input, shape index: {}]   ;;  %s1179_s2 = inlined_call_operand.vmem [shape: f32[1,128], index: 2, kind: input, shape index: {}]   ;;  %s1180_s4 = inlined_call_operand.vmem [shape: f32[8,32], index: 4, kind: output, shape index: {}]  }
   0x1   :  { %847 = vmatprep.subr.bf16.mxu1 %v987_v0  ;;  %v916_v1 = vld [vmem:[%s1176_s1] sm:$0xff]   ;;  %851 = vmatprep.mubr.msk.bf16.mxu1 %vm988_vm1, %v987_v0  ;;  %23 = vst.msk [vmem:[#allocation3] sm:$0xff] %vm22_vm0, %v987_v0  ;;  %24 = vst.msk [vmem:[#allocation4] sm:$0xff] %vm22_vm0, %v987_v0  ;;  %v919_v4 = vld [vmem:[%s1178_s0 + $0x8] sm:$0xff]  }
   0x2   :  { %v1030_v2 = vld [vmem:[%s1177_s3] sm:$0xff]   ;;  %837 = vmatprep.subr.bf16.mxu0 %v916_v1  ;;  %v1044_v5 = vld [vmem:[%s1177_s3 + $0x8] sm:$0xff]   ;;  %v921_v52 = vld [vmem:[%s1178_s0 + $0x10] sm:$0xff]  }
   0x3   :  { %v918_v3 = vld [vmem:[%s1178_s0] sm:$0xff]   ;;  %848 = vmatpush3.bf16.msra.mxu1 %v1030_v2  ;;  %838 = vmatpush3.bf16.msra.mxu0 %v916_v1  ;;  %v922_v53 = vld [vmem:[%s1178_s0 + $0x18] sm:$0xff]   ;;  %s991_s0 = smov 96  }
   0x4   :  { %839 = vmatprep.mubr.msk.bf16.mxu0 %vm68_vm2, %v918_v3  ;;  %849 = vmatprep.subr.bf16.mxu1 %v987_v0  ;;  %v1064_v8 = vld [vmem:[%s1179_s2] ss:$0 sm:$0xff]  ;;  %s990_s2 = smov 32  }
   0x5   :  { %863 = vmatprep.subr.bf16.mxu0 %v987_v0 }
   0x6   :  { %840 = vmatmul.mubr.msk.bf16.vlgmr.msra.gmra.mrb[0].mxu0 %vm68_vm2, %v919_v4 }
   0x7   :  { %850 = vmatpush3.bf16.msra.mxu1 %v1044_v5  ;;  %864 = vmatpush3.bf16.msra.mxu0 %v1030_v2 }
   0x8   :  { %v158_v6 = vld [vmem:[#allocation3] sm:$0xff]  ;;  %855 = vmatprep.subr.bf16.mxu1 %v987_v0  ;;  %865 = vmatprep.subr.bf16.mxu0 %v987_v0  ;;  %v159_v20 = vld [vmem:[#allocation4] sm:$0xff] }
   0x9   :  { %v161_v7 = vpack.c.bf16 %v158_v6, %v158_v6  ;;  %843 = vmatprep.mubr.msk.bf16.mxu0 %vm68_vm2, %v921_v52 }
   0xb   :  { %852 = vmatmul.mubr.msk.bf16.vlgmr.msra.gmra.mrb[0].mxu1 %vm22_vm0, %v161_v7  ;;  %866 = vmatpush3.bf16.msra.mxu0 %v1044_v5 }
   0xc   :  { %856 = vmatpush3.bf16.msra.mxu1 %v1030_v2  ;;  %859 = vmatprep.mubr.msk.bf16.mxu1 %vm988_vm1, %v987_v0 }
   0xd   :  { %857 = vmatprep.subr.bf16.mxu1 %v987_v0  ;;  %879 = vmatprep.subr.bf16.mxu0 %v987_v0 }
   0xe   :  { %844 = vmatmul.mubr.msk.bf16.gmra.mrb[4].mxu0 %vm68_vm2, %v922_v53 }
   0xf   :  { %867 = vmatprep.mubr.msk.bf16.mxu0 %vm988_vm1, %v987_v0 }
  0x10   :  { %858 = vmatpush3.bf16.msra.mxu1 %v1044_v5 }
  0x11   :  { %871 = vmatprep.subr.bf16.mxu1 %v987_v0 }
  0xd9   :  { %v1066_v9 = vpop.f32.mrb[0].mxu0 }
  0xda   :  { %v115_v10 = vpop.f32.mrb[1].mxu0  ;;  %v124_v63 = vadd.f32 %v1066_v9, %v1064_v8 }
  0xdb   :  { %v116_v11 = vadd.f32 %v1064_v8, %v115_v10  ;;  %v1069_v12 = vpop.f32.mrb[2].mxu0 }
  0xdc   :  { %v118_v13 = vpop.f32.mrb[3].mxu0 }
  0xdd   :  { %v119_v36 = vadd.f32 %v1064_v8, %v118_v13 }
  0xde   :  { %v212_v14 = vpop.f32.mrb[0].mxu1 }
  0xdf   :  { %v218_v15 = vadd.f32 %v212_v14, %v116_v11  ;;  %v853_v16 = vpop.f32.mrb[1].mxu1 }
  0xe0   :  { %v215_v17 = vpop.f32.mrb[2].mxu1 }
  0xe1   :  { %923 = vtanh.f32 %v218_v15  ;;  %v854_v18 = vpop.f32.mrb[3].mxu1  ;;  %v793_v21 = vmul.f32 -1.442695, %v218_v15  ;;  %v1098_v58 = vpop.f32.mrb[4].mxu0 }
  0xe2   :  { %v1100_v59 = vpop.f32.mrb[5].mxu0 }
  0xe3   :  { %925 = vpow2.f32 %v793_v21  ;;  %v1102_v60 = vpop.f32.mrb[6].mxu0 }
  0xe4   :  { %v1104_v61 = vpop.f32.mrb[7].mxu0 }
  0xeb   :  { %v924_v19 = vpop.eup %923 }
  0xec   :  { %232 = vrot.lane.b32.xlu0 %v924_v19, %s989_s25 }
  0xed   :  { %v926_v22 = vpop.eup %925 }
  0xee   :  { %v222_v23 = vadd.f32 1.0, %v926_v22 }
  0xf0   :  { %227 = vrot.lane.b32.xlu0 %v159_v20, %s990_s2  ;;  %927 = vrcp.f32 %v222_v23 }
  0xfa   :  { %v928_v24 = vpop.eup %927 }
 0x15e   :  { %v233_v25 = vpop.permute.xlu0 %232 }
 0x15f   :  { %v235_v26 = vmul.f32 %v928_v24, %v233_v25  ;;  %v127_v25 = vadd.f32 %v1069_v12, %v1064_v8 }
 0x161   :  { %237 = vrot.lane.b32.xlu1 %v235_v26, %s990_s2 }
 0x162   :  { %v228_v27 = vpop.permute.xlu0 %227 }
 0x163   :  { %v230_v28 = vmul.f32 %v928_v24, %v228_v27 }
 0x1d3   :  { %v238_v29 = vpop.permute.xlu1 %237 }
 0x1d4   :  { %v240_v30 = vadd.f32 %v238_v29, %v230_v28 }
 0x1d6   :  { %929 = vtanh.f32 %v240_v30 }
 0x1e0   :  { %v930_v31 = vpop.eup %929 }
 0x1e1   :  { %243 = vrot.lane.b32.xlu1 %v930_v31, %s989_s25 }
 0x253   :  { %v244_v32 = vpop.permute.xlu1 %243 }
 0x254   :  { %v246_v33 = vmul.f32 %v928_v24, %v244_v32 }
 0x256   :  { %v249_v34 = vpack.c.bf16 %v246_v33, %v246_v33 }
 0x258   :  { %251 = vrot.lane.b32.xlu0 %v249_v34, %s990_s2 }
 0x2ca   :  { %v252_v35 = vpop.permute.xlu0 %251 }
 0x2cb   :  { %860 = vmatmul.mubr.msk.bf16.vlgmr.msra.gmra.mrb[4].mxu1 %vm22_vm0, %v252_v35 }
 0x2cc   :  { %872 = vmatpush3.bf16.msra.mxu1 %v1030_v2  ;;  %875 = vmatprep.mubr.msk.bf16.mxu1 %vm988_vm1, %v987_v0 }
 0x2cd   :  { %873 = vmatprep.subr.bf16.mxu1 %v987_v0 }
 0x2d0   :  { %874 = vmatpush3.bf16.msra.mxu1 %v1044_v5 }
 0x2d1   :  { %887 = vmatprep.subr.bf16.mxu1 %v987_v0 }
 0x39e   :  { %v290_v37 = vpop.f32.mrb[4].mxu1 }
 0x39f   :  { %v296_v38 = vadd.f32 %v290_v37, %v119_v36  ;;  %v861_v39 = vpop.f32.mrb[5].mxu1 }
 0x3a0   :  { %v293_v40 = vpop.f32.mrb[6].mxu1 }
 0x3a1   :  { %931 = vtanh.f32 %v296_v38  ;;  %v862_v41 = vpop.f32.mrb[7].mxu1  ;;  %v795_v43 = vmul.f32 -1.442695, %v296_v38 }
 0x3a3   :  { %933 = vpow2.f32 %v795_v43 }
 0x3ab   :  { %v932_v42 = vpop.eup %931 }
 0x3ac   :  { %306 = vrot.lane.b32.xlu1 %v932_v42, %s989_s25 }
 0x3ad   :  { %v934_v44 = vpop.eup %933 }
 0x3ae   :  { %v300_v45 = vadd.f32 1.0, %v934_v44 }
 0x3b0   :  { %935 = vrcp.f32 %v300_v45  ;;  %v132_v45 = vadd.f32 %v1064_v8, %v1100_v59 }
 0x3ba   :  { %v936_v46 = vpop.eup %935 }
 0x3bb   :  { %v304_v49 = vmul.f32 %v936_v46, %v240_v30 }
 0x41e   :  { %v307_v47 = vpop.permute.xlu1 %306 }
 0x41f   :  { %v309_v48 = vmul.f32 %v936_v46, %v307_v47 }
 0x421   :  { %311 = vrot.lane.b32.xlu0 %v309_v48, %s990_s2 }
 0x493   :  { %v312_v50 = vpop.permute.xlu0 %311 }
 0x494   :  { %v314_v51 = vadd.f32 %v312_v50, %v304_v49 }
 0x496   :  { %937 = vtanh.f32 %v314_v51 }
 0x4a0   :  { %v938_v54 = vpop.eup %937 }
 0x4a1   :  { %317 = vrot.lane.b32.xlu1 %v938_v54, %s989_s25 }
 0x513   :  { %v318_v55 = vpop.permute.xlu1 %317 }
 0x514   :  { %v320_v56 = vmul.f32 %v936_v46, %v318_v55 }
 0x516   :  { %v323_v57 = vpack.c.bf16 %v320_v56, %v320_v56 }
 0x518   :  { %325 = vrot.lane.b32.xlu0 %v323_v57, %s990_s2 }
 0x58a   :  { %v326_v62 = vpop.permute.xlu0 %325 }
 0x58b   :  { %868 = vmatmul.mubr.msk.bf16.vlgmr.msra.gmra.mrb[8].mxu0 %vm22_vm0, %v326_v62 }
 0x58c   :  { %880 = vmatpush3.bf16.msra.mxu0 %v1030_v2  ;;  %883 = vmatprep.mubr.msk.bf16.mxu0 %vm988_vm1, %v987_v0 }
 0x58d   :  { %881 = vmatprep.subr.bf16.mxu0 %v987_v0 }
 0x590   :  { %882 = vmatpush3.bf16.msra.mxu0 %v1044_v5 }
 0x591   :  { %895 = vmatprep.subr.bf16.mxu0 %v987_v0 }
 0x65e   :  { %v364_v1 = vpop.f32.mrb[8].mxu0 }
 0x65f   :  { %v370_v3 = vadd.f32 %v364_v1, %v124_v63  ;;  %v869_v4 = vpop.f32.mrb[9].mxu0 }
 0x660   :  { %v367_v6 = vpop.f32.mrb[10].mxu0 }
 0x661   :  { %939 = vtanh.f32 %v370_v3  ;;  %v870_v7 = vpop.f32.mrb[11].mxu0  ;;  %v797_v11 = vmul.f32 -1.442695, %v370_v3 }
 0x663   :  { %941 = vpow2.f32 %v797_v11 }
 0x66b   :  { %v940_v10 = vpop.eup %939 }
 0x66c   :  { %380 = vrot.lane.b32.xlu1 %v940_v10, %s989_s25  ;;  %v135_v10 = vadd.f32 %v1064_v8, %v1104_v61 }
 0x66d   :  { %v942_v13 = vpop.eup %941 }
 0x66e   :  { %v374_v14 = vadd.f32 1.0, %v942_v13 }
 0x670   :  { %943 = vrcp.f32 %v374_v14 }
 0x67a   :  { %v944_v15 = vpop.eup %943 }
 0x67b   :  { %v378_v9 = vmul.f32 %v944_v15, %v314_v51 }
 0x6de   :  { %v381_v16 = vpop.permute.xlu1 %380 }
 0x6df   :  { %v383_v17 = vmul.f32 %v944_v15, %v381_v16 }
 0x6e1   :  { %385 = vrot.lane.b32.xlu0 %v383_v17, %s990_s2 }
 0x753   :  { %v386_v18 = vpop.permute.xlu0 %385 }
 0x754   :  { %v388_v19 = vadd.f32 %v386_v18, %v378_v9 }
 0x756   :  { %945 = vtanh.f32 %v388_v19 }
 0x760   :  { %v946_v20 = vpop.eup %945 }
 0x761   :  { %391 = vrot.lane.b32.xlu1 %v946_v20, %s989_s25 }
 0x7d3   :  { %v392_v21 = vpop.permute.xlu1 %391 }
 0x7d4   :  { %v394_v22 = vmul.f32 %v944_v15, %v392_v21 }
 0x7d6   :  { %v397_v23 = vpack.c.bf16 %v394_v22, %v394_v22 }
 0x7d8   :  { %399 = vrot.lane.b32.xlu0 %v397_v23, %s990_s2 }
 0x84a   :  { %v400_v24 = vpop.permute.xlu0 %399 }
 0x84b   :  { %876 = vmatmul.mubr.msk.bf16.vlgmr.msra.gmra.mrb[8].mxu1 %vm22_vm0, %v400_v24 }
 0x84c   :  { %888 = vmatpush3.bf16.msra.mxu1 %v1030_v2  ;;  %891 = vmatprep.mubr.msk.bf16.mxu1 %vm988_vm1, %v987_v0 }
 0x84d   :  { %889 = vmatprep.subr.bf16.mxu1 %v987_v0 }
 0x850   :  { %890 = vmatpush3.bf16.msra.mxu1 %v1044_v5 }
 0x851   :  { %903 = vmatprep.subr.bf16.mxu1 %v987_v0 }
 0x91e   :  { %v438_v26 = vpop.f32.mrb[8].mxu1 }
 0x91f   :  { %v444_v27 = vadd.f32 %v438_v26, %v127_v25  ;;  %v877_v28 = vpop.f32.mrb[9].mxu1 }
 0x920   :  { %v441_v29 = vpop.f32.mrb[10].mxu1 }
 0x921   :  { %947 = vtanh.f32 %v444_v27  ;;  %v878_v30 = vpop.f32.mrb[11].mxu1  ;;  %v799_v32 = vmul.f32 -1.442695, %v444_v27  ;;  %v140_v27 = vadd.f32 %v1098_v58, %v1064_v8 }
 0x923   :  { %949 = vpow2.f32 %v799_v32 }
 0x92b   :  { %v948_v31 = vpop.eup %947 }
 0x92c   :  { %454 = vrot.lane.b32.xlu1 %v948_v31, %s989_s25 }
 0x92d   :  { %v950_v33 = vpop.eup %949 }
 0x92e   :  { %v448_v34 = vadd.f32 1.0, %v950_v33 }
 0x930   :  { %951 = vrcp.f32 %v448_v34 }
 0x93a   :  { %v952_v35 = vpop.eup %951 }
 0x93b   :  { %v452_v12 = vmul.f32 %v952_v35, %v388_v19 }
 0x99e   :  { %v455_v36 = vpop.permute.xlu1 %454 }
 0x99f   :  { %v457_v37 = vmul.f32 %v952_v35, %v455_v36 }
 0x9a1   :  { %459 = vrot.lane.b32.xlu0 %v457_v37, %s990_s2 }
 0xa13   :  { %v460_v38 = vpop.permute.xlu0 %459 }
 0xa14   :  { %v462_v39 = vadd.f32 %v460_v38, %v452_v12 }
 0xa16   :  { %953 = vtanh.f32 %v462_v39 }
 0xa20   :  { %v954_v40 = vpop.eup %953 }
 0xa21   :  { %465 = vrot.lane.b32.xlu1 %v954_v40, %s989_s25 }
 0xa93   :  { %v466_v41 = vpop.permute.xlu1 %465 }
 0xa94   :  { %v468_v42 = vmul.f32 %v952_v35, %v466_v41 }
 0xa96   :  { %v471_v43 = vpack.c.bf16 %v468_v42, %v468_v42 }
 0xa98   :  { %473 = vrot.lane.b32.xlu0 %v471_v43, %s990_s2 }
 0xb0a   :  { %v474_v44 = vpop.permute.xlu0 %473 }
 0xb0b   :  { %884 = vmatmul.mubr.msk.bf16.vlgmr.msra.gmra.mrb[12].mxu0 %vm22_vm0, %v474_v44 }
 0xb0c   :  { %896 = vmatpush3.bf16.msra.mxu0 %v1030_v2  ;;  %899 = vmatprep.mubr.msk.bf16.mxu0 %vm988_vm1, %v987_v0 }
 0xb0d   :  { %897 = vmatprep.subr.bf16.mxu0 %v987_v0 }
 0xb10   :  { %898 = vmatpush3.bf16.msra.mxu0 %v1044_v5 }
 0xbde   :  { %v512_v46 = vpop.f32.mrb[12].mxu0 }
 0xbdf   :  { %v518_v47 = vadd.f32 %v512_v46, %v132_v45  ;;  %v885_v48 = vpop.f32.mrb[13].mxu0  ;;  %v143_v46 = vadd.f32 %v1102_v60, %v1064_v8 }
 0xbe0   :  { %v515_v49 = vpop.f32.mrb[14].mxu0 }
 0xbe1   :  { %955 = vtanh.f32 %v518_v47  ;;  %v886_v50 = vpop.f32.mrb[15].mxu0  ;;  %v801_v52 = vmul.f32 -1.442695, %v518_v47 }
 0xbe3   :  { %957 = vpow2.f32 %v801_v52 }
 0xbeb   :  { %v956_v51 = vpop.eup %955 }
 0xbec   :  { %528 = vrot.lane.b32.xlu1 %v956_v51, %s989_s25 }
 0xbed   :  { %v958_v53 = vpop.eup %957 }
 0xbee   :  { %v522_v54 = vadd.f32 1.0, %v958_v53 }
 0xbf0   :  { %959 = vrcp.f32 %v522_v54 }
 0xbfa   :  { %v960_v55 = vpop.eup %959 }
 0xbfb   :  { %v526_v59 = vmul.f32 %v960_v55, %v462_v39 }
 0xc5e   :  { %v529_v56 = vpop.permute.xlu1 %528 }
 0xc5f   :  { %v531_v57 = vmul.f32 %v960_v55, %v529_v56 }
 0xc61   :  { %533 = vrot.lane.b32.xlu0 %v531_v57, %s990_s2 }
 0xcd3   :  { %v534_v62 = vpop.permute.xlu0 %533 }
 0xcd4   :  { %v536_v63 = vadd.f32 %v534_v62, %v526_v59 }
 0xcd6   :  { %961 = vtanh.f32 %v536_v63 }
 0xce0   :  { %v962_v1 = vpop.eup %961 }
 0xce1   :  { %539 = vrot.lane.b32.xlu1 %v962_v1, %s989_s25 }
 0xd53   :  { %v540_v3 = vpop.permute.xlu1 %539 }
 0xd54   :  { %v542_v4 = vmul.f32 %v960_v55, %v540_v3 }
 0xd56   :  { %v545_v6 = vpack.c.bf16 %v542_v4, %v542_v4 }
 0xd58   :  { %547 = vrot.lane.b32.xlu0 %v545_v6, %s990_s2 }
 0xdca   :  { %v548_v7 = vpop.permute.xlu0 %547 }
 0xdcb   :  { %892 = vmatmul.mubr.msk.bf16.vlgmr.msra.gmra.mrb[12].mxu1 %vm22_vm0, %v548_v7 }
 0xdcc   :  { %904 = vmatpush3.bf16.msra.mxu1 %v1030_v2  ;;  %907 = vmatprep.mubr.msk.bf16.mxu1 %vm988_vm1, %v987_v0 }
 0xdcd   :  { %905 = vmatprep.subr.bf16.mxu1 %v987_v0 }
 0xdd0   :  { %906 = vmatpush3.bf16.msra.mxu1 %v1044_v5 }
 0xe9e   :  { %v586_v11 = vpop.f32.mrb[12].mxu1 }
 0xe9f   :  { %v592_v13 = vadd.f32 %v586_v11, %v135_v10  ;;  %v893_v14 = vpop.f32.mrb[13].mxu1 }
 0xea0   :  { %v589_v15 = vpop.f32.mrb[14].mxu1 }
 0xea1   :  { %963 = vtanh.f32 %v592_v13  ;;  %v894_v16 = vpop.f32.mrb[15].mxu1  ;;  %v803_v2 = vmul.f32 -1.442695, %v592_v13 }
 0xea3   :  { %965 = vpow2.f32 %v803_v2 }
 0xeab   :  { %v964_v17 = vpop.eup %963 }
 0xeac   :  { %602 = vrot.lane.b32.xlu1 %v964_v17, %s989_s25 }
 0xead   :  { %v966_v9 = vpop.eup %965 }
 0xeae   :  { %v596_v18 = vadd.f32 1.0, %v966_v9 }
 0xeb0   :  { %967 = vrcp.f32 %v596_v18 }
 0xeba   :  { %v968_v0 = vpop.eup %967 }
 0xebb   :  { %v600_v61 = vmul.f32 %v968_v0, %v536_v63 }
 0xf1e   :  { %v603_v19 = vpop.permute.xlu1 %602 }
 0xf1f   :  { %v605_v5 = vmul.f32 %v968_v0, %v603_v19 }
 0xf21   :  { %607 = vrot.lane.b32.xlu0 %v605_v5, %s990_s2 }
 0xf93   :  { %v608_v20 = vpop.permute.xlu0 %607 }
 0xf94   :  { %v610_v21 = vadd.f32 %v608_v20, %v600_v61 }
 0xf96   :  { %969 = vtanh.f32 %v610_v21 }
 0xfa0   :  { %v970_v22 = vpop.eup %969 }
 0xfa1   :  { %613 = vrot.lane.b32.xlu1 %v970_v22, %s989_s25 }
0x1013   :  { %v614_v23 = vpop.permute.xlu1 %613 }
0x1014   :  { %v616_v24 = vmul.f32 %v968_v0, %v614_v23 }
0x1016   :  { %v619_v25 = vpack.c.bf16 %v616_v24, %v616_v24 }
0x1018   :  { %621 = vrot.lane.b32.xlu0 %v619_v25, %s990_s2 }
0x108a   :  { %v622_v26 = vpop.permute.xlu0 %621 }
0x108b   :  { %900 = vmatmul.mubr.msk.bf16.vlgmr.msra.gmra.mrb[16].mxu0 %vm22_vm0, %v622_v26 }
0x115e   :  { %v660_v28 = vpop.f32.mrb[16].mxu0 }
0x115f   :  { %v666_v29 = vadd.f32 %v660_v28, %v140_v27  ;;  %v901_v30 = vpop.f32.mrb[17].mxu0 }
0x1160   :  { %v663_v31 = vpop.f32.mrb[18].mxu0 }
0x1161   :  { %971 = vtanh.f32 %v666_v29  ;;  %v902_v32 = vpop.f32.mrb[19].mxu0  ;;  %v805_v34 = vmul.f32 -1.442695, %v666_v29 }
0x1163   :  { %973 = vpow2.f32 %v805_v34 }
0x116b   :  { %v972_v33 = vpop.eup %971 }
0x116c   :  { %676 = vrot.lane.b32.xlu1 %v972_v33, %s989_s25 }
0x116d   :  { %v974_v35 = vpop.eup %973 }
0x116e   :  { %v670_v36 = vadd.f32 1.0, %v974_v35 }
0x1170   :  { %975 = vrcp.f32 %v670_v36 }
0x117a   :  { %v976_v37 = vpop.eup %975 }
0x117b   :  { %v674_v58 = vmul.f32 %v976_v37, %v610_v21 }
0x11de   :  { %v677_v12 = vpop.permute.xlu1 %676 }
0x11df   :  { %v679_v38 = vmul.f32 %v976_v37, %v677_v12 }
0x11e1   :  { %681 = vrot.lane.b32.xlu0 %v679_v38, %s990_s2 }
0x1253   :  { %v682_v39 = vpop.permute.xlu0 %681 }
0x1254   :  { %v684_v40 = vadd.f32 %v682_v39, %v674_v58 }
0x1256   :  { %977 = vtanh.f32 %v684_v40 }
0x1260   :  { %v978_v41 = vpop.eup %977 }
0x1261   :  { %687 = vrot.lane.b32.xlu1 %v978_v41, %s989_s25 }
0x12d3   :  { %v688_v42 = vpop.permute.xlu1 %687 }
0x12d4   :  { %v690_v43 = vmul.f32 %v976_v37, %v688_v42 }
0x12d6   :  { %v693_v44 = vpack.c.bf16 %v690_v43, %v690_v43 }
0x12d8   :  { %695 = vrot.lane.b32.xlu0 %v693_v44, %s990_s2 }
0x134a   :  { %v696_v45 = vpop.permute.xlu0 %695 }
0x134b   :  { %908 = vmatmul.mubr.msk.bf16.vlgmr.msra.gmra.mrb[16].mxu1 %vm22_vm0, %v696_v45 }
0x141e   :  { %v734_v47 = vpop.f32.mrb[16].mxu1 }
0x141f   :  { %v740_v48 = vadd.f32 %v734_v47, %v143_v46  ;;  %v909_v49 = vpop.f32.mrb[17].mxu1 }
0x1420   :  { %v737_v50 = vpop.f32.mrb[18].mxu1 }
0x1421   :  { %979 = vtanh.f32 %v740_v48  ;;  %v910_v51 = vpop.f32.mrb[19].mxu1  ;;  %v807_v53 = vmul.f32 -1.442695, %v740_v48 }
0x1423   :  { %981 = vpow2.f32 %v807_v53 }
0x142b   :  { %v980_v52 = vpop.eup %979 }
0x142c   :  { %750 = vrot.lane.b32.xlu1 %v980_v52, %s989_s25 }
0x142d   :  { %v982_v54 = vpop.eup %981 }
0x142e   :  { %v744_v55 = vadd.f32 1.0, %v982_v54 }
0x1430   :  { %983 = vrcp.f32 %v744_v55 }
0x143a   :  { %v984_v56 = vpop.eup %983 }
0x143b   :  { %v748_v8 = vmul.f32 %v984_v56, %v684_v40 }
0x149e   :  { %v751_v57 = vpop.permute.xlu1 %750 }
0x149f   :  { %v753_v59 = vmul.f32 %v984_v56, %v751_v57 }
0x14a1   :  { %755 = vrot.lane.b32.xlu0 %v753_v59, %s990_s2 }
0x1513   :  { %v756_v60 = vpop.permute.xlu0 %755 }
0x1514   :  { %v758_v62 = vadd.f32 %v756_v60, %v748_v8 }
0x1516   :  { %985 = vtanh.f32 %v758_v62 }
0x1520   :  { %v986_v63 = vpop.eup %985 }
0x1521   :  { %761 = vrot.lane.b32.xlu1 %v986_v63, %s989_s25 }
0x1525   :  { %771 = vrot.lane.b32.xlu1 %v758_v62, %s991_s0 }
0x1593   :  { %v762_v1 = vpop.permute.xlu1 %761 }
0x1594   :  { %v764_v3 = vmul.f32 %v984_v56, %v762_v1 }
0x1596   :  { %766 = vrot.lane.b32.xlu0 %v764_v3, %s990_s2 }
0x1597   :  { %v772_v4 = vpop.permute.xlu1 %771 }
0x1598   :  { %774 = vst.msk [vmem:[#allocation4] sm:$0xff] %vm22_vm0, %v772_v4 }
0x1608   :  { %v767_v6 = vpop.permute.xlu0 %766 }
0x1609   :  { %769 = vst.msk [vmem:[#allocation3] sm:$0xff] %vm22_vm0, %v767_v6  ;;  %775 = vst.msk [vmem:[%s1180_s4] sm:$0xff] %vm22_vm0, %v767_v6 }

</bundles_post_ra>
